<compile_context>
chip_gen: v7x
topology: tpu7x:2x2x1
jax: 0.10.0
libtpu: 0.0.40
codegen_flags: <defaults>
</compile_context>

<pallas_src>
import jax
import jax.numpy as jnp
from jax.experimental import pallas as pl
from jax.experimental.pallas import tpu as pltpu


def conv1x1_tanh2_kernel(x_ref, w_ref, b_ref, o_ref):
    # x_ref: (1, Cin, t_hw)   VMEM tile (channels on sublanes, spatial on lanes)
    # w_ref: (Cout, Cin)      resident
    # b_ref: (Cout, 1)        f32, resident
    # o_ref: (1, Cout, t_hw)  lane-dense output tile
    x = x_ref[0]                                   # (Cin, t_hw)
    acc = jnp.dot(w_ref[...], x,
                  preferred_element_type=jnp.float32)   # (Cout, t_hw), f32
    acc = acc + b_ref[...]                         # broadcast (Cout, 1)
    # double tanh rides the EUP/VPU slots, hidden under the DMA stream
    o_ref[0] = jnp.tanh(jnp.tanh(acc)).astype(o_ref.dtype)


def _choose_spatial_tile(hw, cap=8192):
    """Pick a lane tile (multiple of 128, <= cap) and the padded HW extent."""
    hw_128 = ((hw + 127) // 128) * 128
    t_hw = min(hw_128, cap)
    hw_pad = ((hw + t_hw - 1) // t_hw) * t_hw
    return t_hw, hw_pad


def conv1x1_double_tanh(x_nchw, weight, bias, *, t_hw_cap=8192):
    """1x1 conv (Cin->Cout) + tanh(tanh(.)) on NCHW input, no transposes.

    x_nchw: (N, Cin, H, W); weight: (Cout, Cin); bias: (Cout,).
    Returns (N, Cout, H, W).
    """
    N, Cin, H, W = x_nchw.shape
    Cout = weight.shape[0]
    HW = H * W

    # Tile the spatial axis; pad (with zeros) only if HW is not a multiple of
    # the tile — padded columns are computed and then sliced away (no masking
    # needed since every output column is independent).
    t_hw, hw_pad = _choose_spatial_tile(HW, t_hw_cap)

    x_rows = x_nchw.reshape(N, Cin, HW)
    if hw_pad != HW:
        x_rows = jnp.pad(x_rows, ((0, 0), (0, 0), (0, hw_pad - HW)))

    w = weight.astype(x_rows.dtype)                 # (Cout, Cin)
    b = bias.reshape(Cout, 1).astype(jnp.float32)   # (Cout, 1)

    grid = (N, hw_pad // t_hw)

    out = pl.pallas_call(
        conv1x1_tanh2_kernel,
        out_shape=jax.ShapeDtypeStruct((N, Cout, hw_pad), x_rows.dtype),
        grid_spec=pltpu.PrefetchScalarGridSpec(
            num_scalar_prefetch=0,
            grid=grid,
            in_specs=[
                pl.BlockSpec((1, Cin, t_hw), lambda n, j: (n, 0, j)),
                pl.BlockSpec((Cout, Cin), lambda n, j: (0, 0)),
                pl.BlockSpec((Cout, 1), lambda n, j: (0, 0)),
            ],
            out_specs=pl.BlockSpec((1, Cout, t_hw), lambda n, j: (n, 0, j)),
        ),
        compiler_params=pltpu.CompilerParams(
            # both axes are independent -> shardable across v7x's 2 TCs
            dimension_semantics=("parallel", "parallel"),
        ),
    )(x_rows, w, b)

    if hw_pad != HW:
        out = out[:, :, :HW]
    return out.reshape(N, Cout, H, W)


if __name__ == "__main__":
    key = jax.random.PRNGKey(0)
    k_x, k_w, k_b = jax.random.split(key, 3)

    # Module spec: Conv2d(64, 8, kernel_size=1)
    N, Cin, H, W = 2, 64, 16, 16
    Cout = 8

    x1 = jax.random.normal(k_x, (N, Cin, H, W), dtype=jnp.float32)

    # Deterministic parameter init (Conv2d(64, 8, 1) shapes):
    # weight (Cout, Cin, 1, 1) stored as (Cout, Cin); bias (Cout,)
    bound = 1.0 / jnp.sqrt(jnp.float32(Cin))  # fan_in = Cin * 1 * 1
    weight = jax.random.uniform(k_w, (Cout, Cin), jnp.float32, -bound, bound)
    bias = jax.random.uniform(k_b, (Cout,), jnp.float32, -bound, bound)

    out = conv1x1_double_tanh(x1, weight, bias)
    out = jax.block_until_ready(out)

    # Reference check in plain JAX (1x1 conv == channel matmul)
    ref = jnp.einsum("nchw,oc->nohw", x1, weight) + bias[None, :, None, None]
    ref = jnp.tanh(jnp.tanh(ref))
    assert out.shape == (N, Cout, H, W)
    assert jnp.allclose(out, ref, atol=1e-5, rtol=1e-5)

    print("KERNEL_OK")
</pallas_src>

<mosaic_0001>
module attributes {stable_mosaic.version = 11 : i64} {
  func.func @conv1x1_tanh2_kernel(%arg0: i32, %arg1: i32, %arg2: memref<1x64x256xf32, #tpu.memory_space<vmem>>, %arg3: memref<8x64xf32, #tpu.memory_space<vmem>>, %arg4: memref<8x1xf32, #tpu.memory_space<vmem>>, %arg5: memref<1x8x256xf32, #tpu.memory_space<vmem>>) attributes {dimension_semantics = [#tpu.dimension_semantics<parallel>, #tpu.dimension_semantics<parallel>], iteration_bounds = array<i64: 2, 1>, scalar_prefetch = 0 : i64, scratch_operands = 0 : i64, tpu.core_type = #tpu.core_type<tc>, window_params = [{transform_indices = @transform_0, window_bounds = array<i64: 1, 64, 256>}, {pipeline_mode = #tpu.pipeline_mode<synchronous>, transform_indices = @transform_1, window_bounds = array<i64: 8, 64>}, {pipeline_mode = #tpu.pipeline_mode<synchronous>, transform_indices = @transform_2, window_bounds = array<i64: 8, 1>}, {transform_indices = @transform_3, window_bounds = array<i64: 1, 8, 256>}]} {
    %c0 = arith.constant 0 : index
    %c0_0 = arith.constant 0 : index
    %c0_1 = arith.constant 0 : index
    %0 = vector.load %arg2[%c0, %c0_0, %c0_1] : memref<1x64x256xf32, #tpu.memory_space<vmem>>, vector<1x64x256xf32>
    %1 = vector.shape_cast %0 : vector<1x64x256xf32> to vector<64x256xf32>
    %c0_2 = arith.constant 0 : index
    %c0_3 = arith.constant 0 : index
    %2 = vector.load %arg3[%c0_2, %c0_3] : memref<8x64xf32, #tpu.memory_space<vmem>>, vector<8x64xf32>
    %cst = arith.constant dense<0.000000e+00> : vector<8x256xf32>
    %3 = tpu.matmul %2, %1, %cst {dimension_numbers = #tpu.dot_dimension_numbers<[1], [0], [0], [1], [0, 0, 1, 1], [], []>} : vector<8x64xf32>, vector<64x256xf32>, vector<8x256xf32> -> vector<8x256xf32>
    %c0_4 = arith.constant 0 : index
    %c0_5 = arith.constant 0 : index
    %4 = vector.load %arg4[%c0_4, %c0_5] : memref<8x1xf32, #tpu.memory_space<vmem>>, vector<8x1xf32>
    %5 = vector.broadcast %4 : vector<8x1xf32> to vector<8x256xf32>
    %6 = arith.addf %3, %5 : vector<8x256xf32>
    %7 = math.tanh %6 : vector<8x256xf32>
    %8 = math.tanh %7 : vector<8x256xf32>
    %c0_6 = arith.constant 0 : index
    %c0_7 = arith.constant 0 : index
    %c0_8 = arith.constant 0 : index
    %9 = vector.load %arg5[%c0_6, %c0_7, %c0_8] : memref<1x8x256xf32, #tpu.memory_space<vmem>>, vector<1x8x256xf32>
    %10 = vector.shape_cast %9 : vector<1x8x256xf32> to vector<8x256xf32>
    %11 = vector.shape_cast %8 : vector<8x256xf32> to vector<1x8x256xf32>
    tpu.vector_store %arg5[%c0_6, %c0_7, %c0_8], %11 {strides = array<i32>} : memref<1x8x256xf32, #tpu.memory_space<vmem>>, vector<1x8x256xf32>,
    return
  }
  func.func @transform_0(%arg0: i32, %arg1: i32) -> (i32, i32, i32) {
    %c0_i32 = arith.constant 0 : i32
    %c0_i32_0 = arith.constant 0 : i32
    return %arg0, %c0_i32, %arg1 : i32, i32, i32
  }
  func.func @transform_1(%arg0: i32, %arg1: i32) -> (i32, i32) {
    %c0_i32 = arith.constant 0 : i32
    %c0_i32_0 = arith.constant 0 : i32
    %c0_i32_1 = arith.constant 0 : i32
    return %c0_i32, %c0_i32_0 : i32, i32
  }
  func.func @transform_2(%arg0: i32, %arg1: i32) -> (i32, i32) {
    %c0_i32 = arith.constant 0 : i32
    %c0_i32_0 = arith.constant 0 : i32
    %c0_i32_1 = arith.constant 0 : i32
    return %c0_i32, %c0_i32_0 : i32, i32
  }
  func.func @transform_3(%arg0: i32, %arg1: i32) -> (i32, i32, i32) {
    %c0_i32 = arith.constant 0 : i32
    %c0_i32_0 = arith.constant 0 : i32
    return %arg0, %c0_i32, %arg1 : i32, i32, i32
  }
}

</mosaic_0001>

<bundles_post_ra>
// kernel: tpu_custom_call.1
= control target key start
LH: loop header
LB: loop body
LE: loop exit
PB: predicated region body
PF: predicated region fallthrough
CT: control target
= control target key end

     0   :  { %8 = vsyncpa [#allocation3], 0  ;;  %s861_s0 = inlined_call_operand.hbm [shape: f32[2,64,256], index: 0, kind: input, shape index: {}]   ;;  %s862_s1 = inlined_call_operand.vmem [shape: f32[8,64], index: 1, kind: input, shape index: {}]   ;;  %s863_s2 = inlined_call_operand.vmem [shape: f32[8,1], index: 2, kind: input, shape index: {}]   ;;  %s864_s3 = inlined_call_operand.hbm [shape: f32[2,8,256], index: 3, kind: output, shape index: {}]  }
   0x1   :  { %10 = vsyncpa [#allocation3 + $0x1], 0 }
   0x2   :  { %11 = vsyncpa [#allocation4], 0 }
   0x3   :  { %13 = vsyncpa [#allocation4 + $0x1], 0  ;;  %s663_s12 = smov 0   ;;  %s665_s13 = smov 0  }
   0x4   :  { %s667_s14 = smov 0   ;;  %s669_s15 = smov 0  }
   0x5   :  { %s671_s16 = smov 0   ;;  %s673_s17 = smov 0  }
   0x6 LB: > { %s414_s18 = sadd.s32 4294967295, %s635_s17   ;;  %s415_s19 = sadd.s32 4294967294, %s635_s17   ;;  %s635_s17 = sphi %s673_s17, %s19_s17   ;;  %s631_s16 = sphi %s671_s16, %s879_s16   ;;  %s627_s15 = sphi %s669_s15, %s878_s15   ;;  %s623_s14 = sphi %s667_s14, %s877_s14   ;;  %s619_s13 = sphi %s665_s13, %s876_s13   ;;  %s615_s12 = sphi %s663_s12, %s875_s12  }
   0x7   : > { %s31_s20 = sadd.s32 1, %s631_s16  ;;  %s40_s21 = sadd.s32 1, %s623_s14 }
   0x8   : > { %p33_p0 = scmp.ge.s32.totalorder %s31_s20, 2  ;;  %p47_p1 = scmp.ne.s32.totalorder %s623_s14, %s619_s13 }
   0x9   : > { %p48_p2 = scmp.eq.s32.totalorder %s635_s17, 0  ;;  %p53_p3 = scmp.ne.s32.totalorder %s619_s13, %s615_s12 }
   0xa   : > { %s881_s20 = smov (%p33_p0, %s31_s20), 0  ;;  %p54_p5 = scmp.eq.s32.totalorder %s414_s18, 0 }
   0xb   : > { %p704_p4 = por %p48_p2, %p47_p1  ;;  %s35_s23 = ssub.s32 %s631_s16, %s881_s20 }
   0xc   : > { %p121_p6 = scmp.eq.s32.totalorder %s414_s18, 1  ;;  %p38_p7 = scmp.eq.s32.totalorder %s35_s23, 0 }
   0xd   : > { %p710_p8 = por %p54_p5, %p53_p3  ;;  %p127_p10 = scmp.eq.s32.totalorder %s415_s19, 1 }
   0xe   : > { %p714_p9 = por %p121_p6, %p47_p1  ;;  %p460_p13 = scmp.lt.s32.totalorder %s635_s17, 2 }
   0xf   : > { %s719_s26 = scalar_select %p38_p7, %s623_s14, %s40_s21  }
  0x10   : > { %s868_s25 = scalar_select %p714_p9, 1, 0 }
  0x11   : > { %p721_p11 = por %p127_p10, %p53_p3  ;;  %s153_s28 = sand.u32 1, %s623_s14  }
  0x12   : > { %s418_s29 = sshll.u32 %s153_s28, 7  ;;  %s430_s30 = sshll.u32 %s631_s16, 11 }
  0x13   : > { %s869_s27 = scalar_select %p721_p11, 1, 0 }
  0x14   : > { %s732_s6 = scalar_lea.hbm %s861_s0, %s430_s30  ;;  %s157_s7 = scalar_lea.vmem [#allocation2], %s418_s29 }
  0x15   : > { %s166_s8 = sshll.u32 %s157_s7, 4  ;;  %p738_p0 = pnand %p460_p13, %p704_p4  ;;  %s734_s8 = int_to_ptr.vmem [resolvable:$true] %s166_s8 }
  0x16   : > { %s743_s10 = scalar_lea.sflag [#allocation3], %s153_s28  ;;  %s523_s11 = scalar_lea.hbm %s732_s6, 2048 }
  0x17   : > { %p524_p2 = scmp.ne.s32.totalorder %s732_s6, %s523_s11  ;;  %p525_p3 = pneg %p738_p0 }
  0x18   : > { %s528_s21 = scalar_lea.hbm %s861_s0, 4096  ;;  %p529_p4 = scmp.lt.u32.totalorder %s732_s6, %s861_s0 }
  0x19   : > { %p526_p5 = pnand %p525_p3, %p524_p2  ;;  %p530_p7 = scmp.lt.u32.totalorder %s528_s21, %s523_s11 }
  0x1a   : > { %p532_p13 = scmp.lt.u32.totalorder %s523_s11, %s732_s6 }
  0x1b   : > { %p527_p6 = pneg %p526_p5  ;;  %p531_p10 = por %p530_p7, %p529_p4 }
  0x1d   : > { %p533_p12 = por %p532_p13, %p531_p10 }
  0x1f   : > { %p534_p1 = pnand %p533_p12, %p527_p6 }
  0x21   : > { %537 = shalt.err (!%p534_p1)
}
  0x22   : > { %s538_s28 = scalar_lea.vmem %s734_s8, 2048  ;;  %s637_s29 = smov [#allocation2]  }
  0x23   : > { %p539_p2 = scmp.ne.s32.totalorder %s734_s8, %s538_s28  ;;  %s543_s30 = sshll.u32 %s637_s29, 4  ;;  %s544_s30 = int_to_ptr.vmem [resolvable:$false] %s543_s30 }
  0x24   : > { %s545_s4 = scalar_lea.vmem %s544_s30, 4096  ;;  %p546_p9 = scmp.lt.s32.totalorder %s734_s8, %s544_s30 }
  0x25   : > { %p541_p5 = pnand %p539_p2, %p525_p3  ;;  %p547_p4 = scmp.lt.s32.totalorder %s545_s4, %s538_s28 }
  0x27   : > { %p542_p11 = pneg %p541_p5  ;;  %p548_p7 = por %p547_p4, %p546_p9 }
  0x29   : > { %p549_p10 = pnand %p548_p7, %p542_p11 }
  0x2b   : > { %552 = shalt.err (!%p549_p10)
}
  0x2c   : > { %s638_s5 = smov 256   ;;  %s639_s7 = smov 16  }
  0x2d   : > { %455 = dma.hbm_to_vmem [thread:$0]  (!%p738_p0), %s732_s6, 2048, %s734_s8, %s743_s10, %s638_s5, %s638_s5, %s639_s7  }
  0x2e   : > { %p174_p12 = scmp.lt.s32.totalorder %s635_s17, 3  ;;  %p871_p1 = scmp.ge.s32.totalorder %s635_s17, 1 }
  0x30   : > { %p175_p3 = pnand %p871_p1, %p174_p12 }
  0x31   : > { %s775_s11 = sand.u32 (!%p175_p3), 1, %s619_s13  }
  0x32   : > { %178 = sbr.rel (%p175_p3) target bundleno = 328 (0x148), region = 32  ;;  %s422_s18 = sshll.u32 (!%p175_p3), %s775_s11, 7 }
  0x33   : > { %s181_s19 = scalar_lea.sflag (!%p175_p3), [#allocation3], %s775_s11  ;;  %s779_s21 = scalar_lea.vmem (!%p175_p3), [#allocation2], %s422_s18 }
  0x39   : > { %606 = dma.done.wait (%p710_p8), %s181_s19, 2048  }
  0x3a   : > { %608 = vsyncadd (%p710_p8), %s181_s19, 4294965248  ;;  %v640_v0 = vmov 0.0   ;;  %v641_v1 = vmov 0   ;;  %v210_v2 = vld [vmem:[%s779_s21 + $0x8] sm:$0xff]  ;;  %v212_v3 = vld [vmem:[%s779_s21 + $0x18] sm:$0xff]  ;;  %vm232_vm0 = vcmask 523264  }
  0x3b   : > { %300 = vmatprep.mubr.f32.mxu0 %v640_v0  ;;  %514 = vset.pattern.permute.xlu0 %v641_v1  ;;  %v209_v4 = vld [vmem:[%s779_s21] sm:$0xff]  ;;  %v432_v5 = vpack.c.bf16 %v212_v3, %v210_v2  ;;  %v211_v6 = vld [vmem:[%s779_s21 + $0x10] sm:$0xff]  ;;  %v214_v7 = vld [vmem:[%s779_s21 + $0x28] sm:$0xff]  ;;  %s423_s10 = sshll.u32 %s775_s11, 4  ;;  %s431_s22 = sshll.u32 %s627_s15, 8 }
  0x3c   : > { %v216_v8 = vld [vmem:[%s779_s21 + $0x38] sm:$0xff]  ;;  %v434_v9 = vpack.c.bf16 %v211_v6, %v209_v4  ;;  %v213_v11 = vld [vmem:[%s779_s21 + $0x20] sm:$0xff]  ;;  %v215_v12 = vld [vmem:[%s779_s21 + $0x30] sm:$0xff]  ;;  %s206_s23 = scalar_lea.vmem [#allocation5], %s423_s10  ;;  %s812_s4 = scalar_lea.hbm %s864_s3, %s431_s22 }
  0x3d   : > { %v436_v10 = vpack.c.bf16 %v216_v8, %v214_v7  ;;  %v218_v13 = vld [vmem:[%s779_s21 + $0x48] sm:$0xff]  ;;  %433 = vmatprep.subr.bf16.mxu0 %v432_v5  ;;  %v220_v14 = vld [vmem:[%s779_s21 + $0x58] sm:$0xff]  ;;  %v438_v15 = vpack.c.bf16 %v215_v12, %v213_v11  ;;  %v217_v17 = vld [vmem:[%s779_s21 + $0x40] sm:$0xff]  ;;  %s330_s28 = sshll.u32 %s206_s23, 4  ;;  %s314_s5 = scalar_lea.sflag [#allocation4], %s775_s11  ;;  %s814_s28 = int_to_ptr.vmem [resolvable:$true] %s330_s28 }
  0x3e   : > { %435 = vmatpush1.bf16.msra.mxu0 %v434_v9  ;;  %v440_v16 = vpack.c.bf16 %v220_v14, %v218_v13  ;;  %v219_v18 = vld [vmem:[%s779_s21 + $0x50] sm:$0xff]  ;;  %v226_v19 = vld [vmem:[%s863_s2] sm:$0xff]  ;;  %v222_v20 = vld [vmem:[%s779_s21 + $0x68] sm:$0xff]  ;;  %s553_s7 = scalar_lea.vmem %s814_s28, 256  ;;  %p872_p9 = scmp.ne.s32.totalorder %s868_s25, 0 }
  0x3f   : > { %437 = vmatprep.subr.bf16.mxu0 %v436_v10  ;;  %v224_v21 = vld [vmem:[%s779_s21 + $0x78] sm:$0xff]  ;;  %229 = vperm.xlu0 %514, %v226_v19   ;;  %v442_v22 = vpack.c.bf16 %v219_v18, %v217_v17  ;;  %v221_v24 = vld [vmem:[%s779_s21 + $0x60] sm:$0xff]  ;;  %v223_v25 = vld [vmem:[%s779_s21 + $0x70] sm:$0xff]  ;;  %p554_p8 = scmp.ne.s32.totalorder %s814_s28, %s553_s7  ;;  %s642_s15 = smov [#allocation5]  }
  0x40   : > { %v444_v23 = vpack.c.bf16 %v224_v21, %v222_v20  ;;  %v446_v26 = vpack.c.bf16 %v223_v25, %v221_v24  ;;  %v225_v27 = vld [vmem:[%s862_s1] sm:$0xff]  ;;  %s557_s18 = sshll.u32 %s642_s15, 4  ;;  %s558_s18 = int_to_ptr.vmem [resolvable:$false] %s557_s18 }
  0x41   : > { %p555_p11 = pnand %p554_p8, %p872_p9  ;;  %s559_s19 = scalar_lea.vmem %s558_s18, 512 }
  0x42   : > { %439 = vmatpush1.bf16.msra.mxu0 %v438_v15  ;;  %p560_p6 = scmp.lt.s32.totalorder %s814_s28, %s558_s18  ;;  %p561_p13 = scmp.lt.s32.totalorder %s559_s19, %s553_s7 }
  0x43   : > { %441 = vmatprep.subr.bf16.mxu0 %v440_v16  ;;  %p556_p0 = pneg %p555_p11 }
  0x44   : > { %p562_p2 = por %p561_p13, %p560_p6 }
  0x46   : > { %443 = vmatpush1.bf16.msra.mxu0 %v442_v22  ;;  %p563_p5 = pnand %p562_p2, %p556_p0 }
  0x47   : > { %445 = vmatprep.subr.bf16.mxu0 %v444_v23 }
  0x4a   : > { %447 = vmatpush1.bf16.msra.mxu0 %v446_v26 }
  0x4d   : > { %424 = vmatmul.mubr.msk.f32.vlgmr.msra.gmra.mrb[0].mxu0 %vm232_vm0, %v225_v27 }
  0xbe   : > { %v230_v28 = vpop.permute.xlu0 %229 }
 0x120   : > { %v302_v29 = vpop.f32.mrb[0].mxu0 }
 0x121   : > { %v303_v30 = vadd.f32 %v302_v29, %v230_v28  ;;  %v304_v31 = vpop.f32.mrb[1].mxu0 }
 0x122   : > { %v305_v32 = vadd.f32 %v304_v31, %v230_v28 }
 0x123   : > { %515 = vtanh.f32 %v303_v30 }
 0x124   : > { %517 = vtanh.f32 %v305_v32 }
 0x12d   : > { %v516_v33 = vpop.eup %515 }
 0x12e   : > { %v518_v34 = vpop.eup %517  ;;  %519 = vtanh.f32 %v516_v33 }
 0x12f   : > { %521 = vtanh.f32 %v518_v34 }
 0x138   : > { %v520_v35 = vpop.eup %519 }
 0x139   : > { %v522_v36 = vpop.eup %521  ;;  %311 = vst [vmem:[%s206_s23] sm:$0xff] %v520_v35 }
 0x13a   : > { %312 = vst [vmem:[%s206_s23 + $0x8] sm:$0xff] %v522_v36 }
 0x13b   : > { %566 = shalt.err (!%p563_p5)
}
 0x13c   : > { %s567_s11 = scalar_lea.hbm %s812_s4, 256  ;;  %s571_s6 = scalar_lea.hbm %s864_s3, 512 }
 0x13d   : > { %p568_p4 = scmp.ne.s32.totalorder %s812_s4, %s567_s11  ;;  %p572_p12 = scmp.lt.u32.totalorder %s812_s4, %s864_s3 }
 0x13e   : > { %p573_p1 = scmp.lt.u32.totalorder %s571_s6, %s567_s11  ;;  %p575_p8 = scmp.lt.u32.totalorder %s567_s11, %s812_s4 }
 0x13f   : > { %p569_p7 = pnand %p568_p4, %p872_p9 }
 0x140   : > { %p574_p3 = por %p573_p1, %p572_p12 }
 0x141   : > { %p570_p10 = pneg %p569_p7 }
 0x142   : > { %p576_p11 = por %p575_p8, %p574_p3 }
 0x144   : > { %p577_p0 = pnand %p576_p11, %p570_p10 }
 0x146   : > { %580 = shalt.err (!%p577_p0)
}
 0x147   : > { %450 = dma.vmem_to_hbm [thread:$0]  (%p872_p9), %s814_s28, 256, %s812_s4, %s314_s5  }
 0x148 PF: > { %s342_s10 = sand.u32 1, %s615_s12   ;;  %p873_p6 = scmp.ne.s32.totalorder %s869_s27, 0 }
 0x149   : > { %p874_p13 = scmp.ge.s32.totalorder %s635_s17, 2  ;;  %s343_s22 = scalar_lea.sflag [#allocation4], %s342_s10 }
 0x14b   : > { %p457_p2 = pnand %p874_p13, %p873_p6 }
 0x14d   : > { %610 = dma.done.wait (!%p457_p2), %s343_s22, 256  }
 0x14e   : > { %612 = vsyncadd (!%p457_p2), %s343_s22, 4294967040  ;;  %s19_s17 = sadd.s32 1, %s635_s17   ;;  %s875_s12 = smov %s619_s13 }
 0x14f   : > { %p16_p5 = scmp.ge.s32.totalorder %s19_s17, 4   ;;  %s876_s13 = smov %s623_s14 }
 0x150   : > { %s877_s14 = smov %s719_s26  ;;  %s878_s15 = smov %s631_s16 }
 0x151   : > { %s879_s16 = smov %s881_s20  ;;  %18 = sbr.rel (!%p16_p5) target bundleno = 6 (0x6), region = 77 }
 0x158   :  { %348 = vsyncpa [#allocation3], 1 }
 0x159   :  { %350 = vsyncpa [#allocation3 + $0x1], 1 }
 0x15a   :  { %351 = vsyncpa [#allocation4], 1 }
 0x15b   :  { %353 = vsyncpa [#allocation4 + $0x1], 1 }

</bundles_post_ra>
